<compile_context>
chip_gen: v7x
topology: tpu7x:2x2x1
jax: 0.10.0
libtpu: 0.0.40
codegen_flags: <defaults>
</compile_context>

<pallas_src>
import jax
import jax.numpy as jnp
from jax.experimental import pallas as pl
from jax.experimental.pallas import tpu as pltpu


def _round_up(n, m):
    return (n + m - 1) // m * m


def _leaky_relu(v, slope=0.1):
    return jnp.where(v > 0, v, slope * v)


def _make_kernel(bf16_epilogue):
    """Fused MLP kernel; bf16 MXU operands, f32 accumulation, epilogue dtype by chip."""
    act_dtype = jnp.bfloat16 if bf16_epilogue else jnp.float32

    def kernel(x_ref,
               w1_ref, b1_ref,
               w2_ref, b2_ref,
               w3_ref, b3_ref,
               w4_ref, b4_ref,
               o_ref):
        h = x_ref[...].astype(jnp.bfloat16)               # cast in-kernel (free VPU slot)
        h = jnp.dot(h, w1_ref[...], preferred_element_type=jnp.float32) + b1_ref[...]
        h = _leaky_relu(h.astype(act_dtype))
        h = jnp.dot(h.astype(jnp.bfloat16), w2_ref[...],
                    preferred_element_type=jnp.float32) + b2_ref[...]
        h = _leaky_relu(h.astype(act_dtype))
        h = jnp.dot(h.astype(jnp.bfloat16), w3_ref[...],
                    preferred_element_type=jnp.float32) + b3_ref[...]
        h = _leaky_relu(h.astype(act_dtype))
        h = jnp.dot(h.astype(jnp.bfloat16), w4_ref[...],
                    preferred_element_type=jnp.float32) + b4_ref[...]
        o_ref[...] = jnp.tanh(h).astype(o_ref.dtype)

    return kernel


def _bf16_vpu_available():
    # v6e (Trillium) / v7x have bf16 VPU+EUP paths; v5e and earlier do not.
    try:
        kind = jax.devices()[0].device_kind.lower()
    except Exception:
        return False
    return any(t in kind for t in ("v6", "v7", "tpu7", "7x", "trillium"))


def _choose_tm(b_eff, tm_max=1024):
    """Batch rows per grid step."""
    if b_eff <= 32:
        return b_eff                                  # single full-dim tile
    # Aim for >=2 grid steps (v7x megacore); keep tiles 16-row aligned (bf16 out).
    half = _round_up(pl.cdiv(b_eff, 2), 16)
    return min(tm_max, half)


def prepare_params(params):
    """One-time prep (hoisted out of the per-call path): bf16 weights, pad the
    last layer to a lane-dense (multiple-of-128) output width. Biases stay f32.
    Returns (prepared_params, out_size)."""
    latent = params["w1"].shape[1]
    out_size = params["w4"].shape[1]
    out_pad = _round_up(out_size, 128)
    w4 = jnp.zeros((latent, out_pad), jnp.float32).at[:, :out_size].set(params["w4"])
    b4 = jnp.zeros((1, out_pad), jnp.float32).at[:, :out_size].set(params["b4"])
    prep = dict(
        w1=params["w1"].astype(jnp.bfloat16),
        w2=params["w2"].astype(jnp.bfloat16),
        w3=params["w3"].astype(jnp.bfloat16),
        w4=w4.astype(jnp.bfloat16),
        b1=params["b1"].astype(jnp.float32),
        b2=params["b2"].astype(jnp.float32),
        b3=params["b3"].astype(jnp.float32),
        b4=b4,
    )
    return prep, out_size


def feature_extractor(x, prep, out_size):
    """x: [B, input_size] f32. prep: output of prepare_params(). -> [B, out_size] f32."""
    B, in_size = x.shape
    latent = prep["w1"].shape[1]
    out_pad = prep["w4"].shape[1]

    # Sublane-align the batch (tiny pad, only when B % 8 != 0).
    b_eff = _round_up(B, 8)
    if b_eff != B:
        x = jnp.pad(x, ((0, b_eff - B), (0, 0)))

    tm = _choose_tm(b_eff)
    grid = (pl.cdiv(b_eff, tm),)

    kernel = _make_kernel(_bf16_vpu_available())

    def resident(shape):
        # Whole-array block + constant index_map => stays VMEM-resident across steps.
        return pl.BlockSpec(shape, lambda i: (0, 0))

    flops = 2 * b_eff * (in_size * latent + 2 * latent * latent + latent * out_pad)
    bytes_accessed = (
        b_eff * in_size * 4                                              # x (f32 in)
        + 2 * (prep["w1"].size + prep["w2"].size + prep["w3"].size + prep["w4"].size)
        + 4 * (prep["b1"].size + prep["b2"].size + prep["b3"].size + prep["b4"].size)
        + b_eff * out_pad * 2                                            # bf16 out
    )
    cost = pl.CostEstimate(flops=flops, transcendentals=b_eff * out_pad,
                           bytes_accessed=bytes_accessed)

    out_padded = pl.pallas_call(
        kernel,
        out_shape=jax.ShapeDtypeStruct((b_eff, out_pad), jnp.bfloat16),
        grid=grid,
        in_specs=[
            pl.BlockSpec((tm, in_size), lambda i: (i, 0)),   # x: unpadded, f32
            resident((in_size, latent)), resident((1, latent)),
            resident((latent, latent)), resident((1, latent)),
            resident((latent, latent)), resident((1, latent)),
            resident((latent, out_pad)), resident((1, out_pad)),
        ],
        out_specs=pl.BlockSpec((tm, out_pad), lambda i: (i, 0)),
        compiler_params=pltpu.CompilerParams(
            dimension_semantics=("parallel",),      # batch steps shard across v7x TCs
            vmem_limit_bytes=32 * 1024 * 1024,      # footprint <~6 MiB even at tm=1024
        ),
        cost_estimate=cost,
    )(x, prep["w1"], prep["b1"], prep["w2"], prep["b2"],
      prep["w3"], prep["b3"], prep["w4"], prep["b4"])

    return out_padded[:B, :out_size].astype(jnp.float32)


def init_params(key, input_size, output_size=50, latent_size=256):
    """Deterministic init matching nn.Linear shapes (weights stored transposed)."""
    sizes = [
        (input_size, latent_size),
        (latent_size, latent_size),
        (latent_size, latent_size),
        (latent_size, output_size),
    ]
    params = {}
    for i, (fan_in, fan_out) in enumerate(sizes, start=1):
        key, kw, kb = jax.random.split(key, 3)
        bound = 1.0 / (fan_in ** 0.5)
        # PyTorch Linear: weight [out, in]; we store W.T -> [in, out]
        params[f"w{i}"] = jax.random.uniform(
            kw, (fan_in, fan_out), jnp.float32, -bound, bound)
        params[f"b{i}"] = jax.random.uniform(
            kb, (1, fan_out), jnp.float32, -bound, bound)
    return params


def _reference(x, params):
    h = x
    for i in range(1, 4):
        h = h @ params[f"w{i}"] + params[f"b{i}"]
        h = jnp.where(h > 0, h, 0.1 * h)
    h = h @ params["w4"] + params["b4"]
    return jnp.tanh(h)


if __name__ == "__main__":
    key = jax.random.PRNGKey(0)
    k_params, k_x = jax.random.split(key)

    input_size = 32
    batch = 8
    params = init_params(k_params, input_size=input_size,
                         output_size=50, latent_size=256)
    x = jax.random.normal(k_x, (batch, input_size), jnp.float32)

    prep, out_size = prepare_params(params)          # one-time weight prep
    out = feature_extractor(x, prep, out_size)
    out = jax.block_until_ready(out)

    ref = _reference(x, params)
    assert out.shape == (batch, 50), out.shape
    # bf16 matmul operands (+ bf16 epilogue/output on v6e/v7x) vs f32 reference.
    err = float(jnp.max(jnp.abs(out - ref)))
    assert err < 3e-2, f"max abs err {err}"
    print("KERNEL_OK")
</pallas_src>

<mosaic_0001>
module attributes {stable_mosaic.version = 11 : i64} {
  func.func @kernel(%arg0: i32, %arg1: memref<8x32xf32, #tpu.memory_space<vmem>>, %arg2: memref<32x256xbf16, #tpu.memory_space<vmem>>, %arg3: memref<1x256xf32, #tpu.memory_space<vmem>>, %arg4: memref<256x256xbf16, #tpu.memory_space<vmem>>, %arg5: memref<1x256xf32, #tpu.memory_space<vmem>>, %arg6: memref<256x256xbf16, #tpu.memory_space<vmem>>, %arg7: memref<1x256xf32, #tpu.memory_space<vmem>>, %arg8: memref<256x128xbf16, #tpu.memory_space<vmem>>, %arg9: memref<1x128xf32, #tpu.memory_space<vmem>>, %arg10: memref<8x128xbf16, #tpu.memory_space<vmem>>) attributes {dimension_semantics = [#tpu.dimension_semantics<parallel>], iteration_bounds = array<i64: 1>, scalar_prefetch = 0 : i64, scratch_operands = 0 : i64, tpu.core_type = #tpu.core_type<tc>, window_params = [{transform_indices = @transform_0, window_bounds = array<i64: 8, 32>}, {pipeline_mode = #tpu.pipeline_mode<synchronous>, transform_indices = @transform_1, window_bounds = array<i64: 32, 256>}, {pipeline_mode = #tpu.pipeline_mode<synchronous>, transform_indices = @transform_2, window_bounds = array<i64: 1, 256>}, {pipeline_mode = #tpu.pipeline_mode<synchronous>, transform_indices = @transform_3, window_bounds = array<i64: 256, 256>}, {pipeline_mode = #tpu.pipeline_mode<synchronous>, transform_indices = @transform_4, window_bounds = array<i64: 1, 256>}, {pipeline_mode = #tpu.pipeline_mode<synchronous>, transform_indices = @transform_5, window_bounds = array<i64: 256, 256>}, {pipeline_mode = #tpu.pipeline_mode<synchronous>, transform_indices = @transform_6, window_bounds = array<i64: 1, 256>}, {pipeline_mode = #tpu.pipeline_mode<synchronous>, transform_indices = @transform_7, window_bounds = array<i64: 256, 128>}, {pipeline_mode = #tpu.pipeline_mode<synchronous>, transform_indices = @transform_8, window_bounds = array<i64: 1, 128>}, {transform_indices = @transform_9, window_bounds = array<i64: 8, 128>}]} {
    %c0 = arith.constant 0 : index
    %c0_0 = arith.constant 0 : index
    %0 = vector.load %arg1[%c0, %c0_0] : memref<8x32xf32, #tpu.memory_space<vmem>>, vector<8x32xf32>
    %1 = arith.truncf %0 : vector<8x32xf32> to vector<8x32xbf16>
    %c0_1 = arith.constant 0 : index
    %c0_2 = arith.constant 0 : index
    %2 = vector.load %arg2[%c0_1, %c0_2] : memref<32x256xbf16, #tpu.memory_space<vmem>>, vector<32x256xbf16>
    %cst = arith.constant dense<0.000000e+00> : vector<8x256xf32>
    %3 = tpu.matmul %1, %2, %cst {dimension_numbers = #tpu.dot_dimension_numbers<[1], [0], [0], [1], [0, 0, 1, 1], [], []>} : vector<8x32xbf16>, vector<32x256xbf16>, vector<8x256xf32> -> vector<8x256xf32>
    %c0_3 = arith.constant 0 : index
    %c0_4 = arith.constant 0 : index
    %4 = vector.load %arg3[%c0_3, %c0_4] : memref<1x256xf32, #tpu.memory_space<vmem>>, vector<1x256xf32>
    %5 = vector.broadcast %4 : vector<1x256xf32> to vector<8x256xf32>
    %6 = arith.addf %3, %5 : vector<8x256xf32>
    %cst_5 = arith.constant 0.000000e+00 : f32
    %7 = vector.broadcast %cst_5 : f32 to vector<8x256xf32>
    %8 = arith.cmpf ogt, %6, %7 : vector<8x256xf32>
    %cst_6 = arith.constant 1.000000e-01 : f32
    %9 = vector.broadcast %cst_6 : f32 to vector<8x256xf32>
    %10 = arith.mulf %9, %6 : vector<8x256xf32>
    %11 = arith.select %8, %6, %10 : vector<8x256xi1>, vector<8x256xf32>
    %12 = arith.truncf %11 : vector<8x256xf32> to vector<8x256xbf16>
    %c0_7 = arith.constant 0 : index
    %c0_8 = arith.constant 0 : index
    %13 = vector.load %arg4[%c0_7, %c0_8] : memref<256x256xbf16, #tpu.memory_space<vmem>>, vector<256x256xbf16>
    %cst_9 = arith.constant dense<0.000000e+00> : vector<8x256xf32>
    %14 = tpu.matmul %12, %13, %cst_9 {dimension_numbers = #tpu.dot_dimension_numbers<[1], [0], [0], [1], [0, 0, 1, 1], [], []>} : vector<8x256xbf16>, vector<256x256xbf16>, vector<8x256xf32> -> vector<8x256xf32>
    %c0_10 = arith.constant 0 : index
    %c0_11 = arith.constant 0 : index
    %15 = vector.load %arg5[%c0_10, %c0_11] : memref<1x256xf32, #tpu.memory_space<vmem>>, vector<1x256xf32>
    %16 = vector.broadcast %15 : vector<1x256xf32> to vector<8x256xf32>
    %17 = arith.addf %14, %16 : vector<8x256xf32>
    %cst_12 = arith.constant 0.000000e+00 : f32
    %18 = vector.broadcast %cst_12 : f32 to vector<8x256xf32>
    %19 = arith.cmpf ogt, %17, %18 : vector<8x256xf32>
    %cst_13 = arith.constant 1.000000e-01 : f32
    %20 = vector.broadcast %cst_13 : f32 to vector<8x256xf32>
    %21 = arith.mulf %20, %17 : vector<8x256xf32>
    %22 = arith.select %19, %17, %21 : vector<8x256xi1>, vector<8x256xf32>
    %23 = arith.truncf %22 : vector<8x256xf32> to vector<8x256xbf16>
    %c0_14 = arith.constant 0 : index
    %c0_15 = arith.constant 0 : index
    %24 = vector.load %arg6[%c0_14, %c0_15] : memref<256x256xbf16, #tpu.memory_space<vmem>>, vector<256x256xbf16>
    %cst_16 = arith.constant dense<0.000000e+00> : vector<8x256xf32>
    %25 = tpu.matmul %23, %24, %cst_16 {dimension_numbers = #tpu.dot_dimension_numbers<[1], [0], [0], [1], [0, 0, 1, 1], [], []>} : vector<8x256xbf16>, vector<256x256xbf16>, vector<8x256xf32> -> vector<8x256xf32>
    %c0_17 = arith.constant 0 : index
    %c0_18 = arith.constant 0 : index
    %26 = vector.load %arg7[%c0_17, %c0_18] : memref<1x256xf32, #tpu.memory_space<vmem>>, vector<1x256xf32>
    %27 = vector.broadcast %26 : vector<1x256xf32> to vector<8x256xf32>
    %28 = arith.addf %25, %27 : vector<8x256xf32>
    %cst_19 = arith.constant 0.000000e+00 : f32
    %29 = vector.broadcast %cst_19 : f32 to vector<8x256xf32>
    %30 = arith.cmpf ogt, %28, %29 : vector<8x256xf32>
    %cst_20 = arith.constant 1.000000e-01 : f32
    %31 = vector.broadcast %cst_20 : f32 to vector<8x256xf32>
    %32 = arith.mulf %31, %28 : vector<8x256xf32>
    %33 = arith.select %30, %28, %32 : vector<8x256xi1>, vector<8x256xf32>
    %34 = arith.truncf %33 : vector<8x256xf32> to vector<8x256xbf16>
    %c0_21 = arith.constant 0 : index
    %c0_22 = arith.constant 0 : index
    %35 = vector.load %arg8[%c0_21, %c0_22] : memref<256x128xbf16, #tpu.memory_space<vmem>>, vector<256x128xbf16>
    %cst_23 = arith.constant dense<0.000000e+00> : vector<8x128xf32>
    %36 = tpu.matmul %34, %35, %cst_23 {dimension_numbers = #tpu.dot_dimension_numbers<[1], [0], [0], [1], [0, 0, 1, 1], [], []>} : vector<8x256xbf16>, vector<256x128xbf16>, vector<8x128xf32> -> vector<8x128xf32>
    %c0_24 = arith.constant 0 : index
    %c0_25 = arith.constant 0 : index
    %37 = vector.load %arg9[%c0_24, %c0_25] : memref<1x128xf32, #tpu.memory_space<vmem>>, vector<1x128xf32>
    %38 = vector.broadcast %37 : vector<1x128xf32> to vector<8x128xf32>
    %39 = arith.addf %36, %38 : vector<8x128xf32>
    %40 = math.tanh %39 : vector<8x128xf32>
    %41 = arith.truncf %40 : vector<8x128xf32> to vector<8x128xbf16>
    %c0_26 = arith.constant 0 : index
    %c0_27 = arith.constant 0 : index
    %42 = vector.load %arg10[%c0_26, %c0_27] : memref<8x128xbf16, #tpu.memory_space<vmem>>, vector<8x128xbf16>
    tpu.vector_store %arg10[%c0_26, %c0_27], %41 {strides = array<i32>} : memref<8x128xbf16, #tpu.memory_space<vmem>>, vector<8x128xbf16>,
    return
  }
  func.func @transform_0(%arg0: i32) -> (i32, i32) {
    %c0_i32 = arith.constant 0 : i32
    %c0_i32_0 = arith.constant 0 : i32
    return %arg0, %c0_i32 : i32, i32
  }
  func.func @transform_1(%arg0: i32) -> (i32, i32) {
    %c0_i32 = arith.constant 0 : i32
    %c0_i32_0 = arith.constant 0 : i32
    %c0_i32_1 = arith.constant 0 : i32
    return %c0_i32, %c0_i32_0 : i32, i32
  }
  func.func @transform_2(%arg0: i32) -> (i32, i32) {
    %c0_i32 = arith.constant 0 : i32
    %c0_i32_0 = arith.constant 0 : i32
    %c0_i32_1 = arith.constant 0 : i32
    return %c0_i32, %c0_i32_0 : i32, i32
  }
  func.func @transform_3(%arg0: i32) -> (i32, i32) {
    %c0_i32 = arith.constant 0 : i32
    %c0_i32_0 = arith.constant 0 : i32
    %c0_i32_1 = arith.constant 0 : i32
    return %c0_i32, %c0_i32_0 : i32, i32
  }
  func.func @transform_4(%arg0: i32) -> (i32, i32) {
    %c0_i32 = arith.constant 0 : i32
    %c0_i32_0 = arith.constant 0 : i32
    %c0_i32_1 = arith.constant 0 : i32
    return %c0_i32, %c0_i32_0 : i32, i32
  }
  func.func @transform_5(%arg0: i32) -> (i32, i32) {
    %c0_i32 = arith.constant 0 : i32
    %c0_i32_0 = arith.constant 0 : i32
    %c0_i32_1 = arith.constant 0 : i32
    return %c0_i32, %c0_i32_0 : i32, i32
  }
  func.func @transform_6(%arg0: i32) -> (i32, i32) {
    %c0_i32 = arith.constant 0 : i32
    %c0_i32_0 = arith.constant 0 : i32
    %c0_i32_1 = arith.constant 0 : i32
    return %c0_i32, %c0_i32_0 : i32, i32
  }
  func.func @transform_7(%arg0: i32) -> (i32, i32) {
    %c0_i32 = arith.constant 0 : i32
    %c0_i32_0 = arith.constant 0 : i32
    %c0_i32_1 = arith.constant 0 : i32
    return %c0_i32, %c0_i32_0 : i32, i32
  }
  func.func @transform_8(%arg0: i32) -> (i32, i32) {
    %c0_i32 = arith.constant 0 : i32
    %c0_i32_0 = arith.constant 0 : i32
    %c0_i32_1 = arith.constant 0 : i32
    return %c0_i32, %c0_i32_0 : i32, i32
  }
  func.func @transform_9(%arg0: i32) -> (i32, i32) {
    %c0_i32 = arith.constant 0 : i32
    %c0_i32_0 = arith.constant 0 : i32
    return %arg0, %c0_i32 : i32, i32
  }
}

</mosaic_0001>

<bundles_post_ra>
// kernel: tpu_custom_call.1
= control target key start
LH: loop header
LB: loop body
LE: loop exit
PB: predicated region body
PF: predicated region fallthrough
CT: control target
= control target key end

     0   :  { %14 = vsyncpa [#allocation3], 0  ;;  %s1435_s0 = inlined_call_operand.hbm [shape: f32[8,32], index: 0, kind: input, shape index: {}]   ;;  %s1436_s1 = inlined_call_operand.hbm [shape: bf16[32,256], index: 1, kind: input, shape index: {}]   ;;  %s1437_s2 = inlined_call_operand.vmem [shape: f32[1,256], index: 2, kind: input, shape index: {}]   ;;  %s1438_s3 = inlined_call_operand.hbm [shape: bf16[256,256], index: 3, kind: input, shape index: {}]   ;;  %s1439_s4 = inlined_call_operand.vmem [shape: f32[1,256], index: 4, kind: input, shape index: {}]   ;;  %s1440_s5 = inlined_call_operand.hbm [shape: bf16[256,256], index: 5, kind: input, shape index: {}]   ;;  %s1441_s6 = inlined_call_operand.vmem [shape: f32[1,256], index: 6, kind: input, shape index: {}]   ;;  %s1442_s7 = inlined_call_operand.hbm [shape: bf16[256,128], index: 7, kind: input, shape index: {}]   ;;  %s1443_s8 = inlined_call_operand.vmem [shape: f32[1,128], index: 8, kind: input, shape index: {}]   ;;  %s1444_s9 = inlined_call_operand.hbm [shape: bf16[8,128], index: 9, kind: output, shape index: {}]  }
   0x1   :  { %15 = vsyncpa [#allocation6], 0 }
   0x2   :  { %16 = vsyncpa [#allocation9], 0 }
   0x3   :  { %17 = vsyncpa [#allocation4], 0  ;;  %s1271_s30 = smov [#allocation5]   ;;  %s1131_s13 = scalar_lea.hbm %s1436_s1, 512 }
   0x4   :  { %s33_s10 = sshll.u32 %s1271_s30, 4  ;;  %p1132_p0 = scmp.ne.s32.totalorder %s1436_s1, %s1131_s13  ;;  %s34_s10 = int_to_ptr.vmem [resolvable:$true] %s33_s10 }
   0x5   :  { %p1135_p1 = scmp.lt.u32.totalorder %s1131_s13, %s1436_s1 }
   0x7   :  { %p1137_p2 = pnand %p1135_p1, %p1132_p0 }
   0x9   :  { %1140 = shalt.err (!%p1137_p2)
}
   0xa   :  { %s1141_s18 = scalar_lea.vmem %s34_s10, 512  ;;  %p1146_p4 = scmp.lt.s32.totalorder %s34_s10, %s34_s10 }
   0xb   :  { %p1142_p3 = scmp.ne.s32.totalorder %s34_s10, %s1141_s18  ;;  %p1147_p5 = scmp.lt.s32.totalorder %s1141_s18, %s1141_s18 }
   0xd   :  { %p1148_p6 = por %p1147_p5, %p1146_p4 }
   0xf   :  { %p1149_p7 = pnand %p1148_p6, %p1142_p3 }
  0x11   :  { %1152 = shalt.err (!%p1149_p7)
}
  0x12   :  { %s1272_s19 = smov 128   ;;  %s1273_s20 = smov 8  }
  0x13   :  { %39 = dma.hbm_to_vmem [thread:$0]  %s1436_s1, 512, %s34_s10, [#allocation6], %s1272_s19, %s1272_s19, %s1273_s20  }
  0x14   :  { %s1274_s23 = smov [#allocation8]   ;;  %s1275_s25 = smov [#allocation2]  }
  0x15   :  { %s61_s24 = sshll.u32 %s1274_s23, 4  ;;  %s24_s26 = sshll.u32 %s1275_s25, 4  ;;  %s62_s24 = int_to_ptr.vmem [resolvable:$true] %s61_s24  ;;  %s25_s26 = int_to_ptr.vmem [resolvable:$true] %s24_s26 }
  0x16   :  { %s1153_s29 = scalar_lea.hbm %s1440_s5, 4096 }
  0x17   :  { %p1154_p8 = scmp.ne.s32.totalorder %s1440_s5, %s1153_s29  ;;  %p1157_p9 = scmp.lt.u32.totalorder %s1153_s29, %s1440_s5 }
  0x19   :  { %p1159_p10 = pnand %p1157_p9, %p1154_p8 }
  0x1b   :  { %1162 = shalt.err (!%p1159_p10)
}
  0x1c   :  { %s1163_s1 = scalar_lea.vmem %s62_s24, 4096  ;;  %p1168_p12 = scmp.lt.s32.totalorder %s62_s24, %s62_s24 }
  0x1d   :  { %p1164_p11 = scmp.ne.s32.totalorder %s62_s24, %s1163_s1  ;;  %p1169_p13 = scmp.lt.s32.totalorder %s1163_s1, %s1163_s1 }
  0x1f   :  { %p1170_p0 = por %p1169_p13, %p1168_p12 }
  0x21   :  { %p1171_p1 = pnand %p1170_p0, %p1164_p11 }
  0x23   :  { %1174 = shalt.err (!%p1171_p1)
}
  0x24   :  { %67 = dma.hbm_to_vmem [thread:$0]  %s1440_s5, 4096, %s62_s24, [#allocation9], %s1272_s19, %s1272_s19, %s1273_s20  }
  0x25   :  { %s1175_s17 = scalar_lea.hbm %s1435_s0, 128 }
  0x26   :  { %p1176_p2 = scmp.ne.s32.totalorder %s1435_s0, %s1175_s17  ;;  %p1179_p3 = scmp.lt.u32.totalorder %s1175_s17, %s1435_s0 }
  0x28   :  { %p1181_p4 = pnand %p1179_p3, %p1176_p2 }
  0x2a   :  { %1184 = shalt.err (!%p1181_p4)
}
  0x2b   :  { %s1185_s25 = scalar_lea.vmem %s25_s26, 128  ;;  %p1190_p6 = scmp.lt.s32.totalorder %s25_s26, %s25_s26 }
  0x2c   :  { %p1186_p5 = scmp.ne.s32.totalorder %s25_s26, %s1185_s25  ;;  %p1191_p7 = scmp.lt.s32.totalorder %s1185_s25, %s1185_s25 }
  0x2e   :  { %p1192_p8 = por %p1191_p7, %p1190_p6 }
  0x30   :  { %p1193_p9 = pnand %p1192_p8, %p1186_p5 }
  0x32   :  { %1196 = shalt.err (!%p1193_p9)
}
  0x33   :  { %27 = dma.hbm_to_vmem [thread:$0]  %s1435_s0, 128, %s25_s26, [#allocation3]  }
  0x34   :  { %s1276_s27 = smov [#allocation7]   ;;  %s1277_s29 = smov [#allocation10]  }
  0x35   :  { %s47_s28 = sshll.u32 %s1276_s27, 4  ;;  %s75_s30 = sshll.u32 %s1277_s29, 4  ;;  %s48_s28 = int_to_ptr.vmem [resolvable:$true] %s47_s28  ;;  %s76_s30 = int_to_ptr.vmem [resolvable:$true] %s75_s30 }
  0x36   :  { %s1197_s13 = scalar_lea.hbm %s1438_s3, 4096 }
  0x37   :  { %p1198_p10 = scmp.ne.s32.totalorder %s1438_s3, %s1197_s13  ;;  %p1201_p11 = scmp.lt.u32.totalorder %s1197_s13, %s1438_s3 }
  0x39   :  { %p1203_p12 = pnand %p1201_p11, %p1198_p10 }
  0x3b   :  { %1206 = shalt.err (!%p1203_p12)
}
  0x3c   :  { %s1207_s0 = scalar_lea.vmem %s48_s28, 4096  ;;  %p1212_p0 = scmp.lt.s32.totalorder %s48_s28, %s48_s28 }
  0x3d   :  { %p1208_p13 = scmp.ne.s32.totalorder %s48_s28, %s1207_s0  ;;  %p1213_p1 = scmp.lt.s32.totalorder %s1207_s0, %s1207_s0 }
  0x3f   :  { %p1214_p2 = por %p1213_p1, %p1212_p0 }
  0x41   :  { %p1215_p3 = pnand %p1214_p2, %p1208_p13 }
  0x43   :  { %1218 = shalt.err (!%p1215_p3)
}
  0x44   :  { %53 = dma.hbm_to_vmem [thread:$0]  %s1438_s3, 4096, %s48_s28, [#allocation6], %s1272_s19, %s1272_s19, %s1273_s20  }
  0x45   :  { %s1219_s21 = scalar_lea.hbm %s1442_s7, 2048 }
  0x46   :  { %p1220_p4 = scmp.ne.s32.totalorder %s1442_s7, %s1219_s21  ;;  %p1223_p5 = scmp.lt.u32.totalorder %s1219_s21, %s1442_s7 }
  0x48   :  { %p1225_p6 = pnand %p1223_p5, %p1220_p4 }
  0x4a   :  { %1228 = shalt.err (!%p1225_p6)
}
  0x4b   :  { %s1229_s24 = scalar_lea.vmem %s76_s30, 2048  ;;  %p1234_p8 = scmp.lt.s32.totalorder %s76_s30, %s76_s30 }
  0x4c   :  { %p1230_p7 = scmp.ne.s32.totalorder %s76_s30, %s1229_s24  ;;  %p1235_p9 = scmp.lt.s32.totalorder %s1229_s24, %s1229_s24 }
  0x4e   :  { %p1236_p10 = por %p1235_p9, %p1234_p8 }
  0x50   :  { %p1237_p11 = pnand %p1236_p10, %p1230_p7 }
  0x52   :  { %1240 = shalt.err (!%p1237_p11)
}
  0x53   :  { %s1278_s3 = smov 64   ;;  %s1279_s19 = smov 4  }
  0x54   :  { %81 = dma.hbm_to_vmem [thread:$0]  %s1442_s7, 2048, %s76_s30, [#allocation9], %s1278_s3, %s1278_s3, %s1279_s19  }
  0x55   :  { %1263 = dma.done.wait [#allocation3], 128  }
  0x56   :  { %1264 = vsyncadd [#allocation3], 4294967168 }
  0x57   :  { %1265 = dma.done.wait [#allocation6], 4608  }
  0x58   :  { %1266 = vsyncadd [#allocation6], 4294962688 }
  0x59   :  { %1267 = dma.done.wait [#allocation9], 6144  }
  0x5a   :  { %1268 = vsyncadd [#allocation9], 4294961152  ;;  %v1280_v0 = vmov 0   ;;  %v1011_v1 = vld [vmem:[#allocation5 + $0x4] ss:$8 sps:$4 sm:$0xff]   ;;  %v100_v5 = vld [vmem:[#allocation2] sm:$0xff] }
  0x5b   :  { %174 = vmatprep.mubr.bf16.mxu0 %v1280_v0  ;;  %v1013_v2 = vld [vmem:[#allocation5] ss:$8 sps:$4 sm:$0xff]   ;;  %142 = vmatprep.subr.bf16.mxu0 %v1011_v1  ;;  %v1014_v3 = vld [vmem:[#allocation5 + $0x14] ss:$8 sps:$4 sm:$0xff]   ;;  %v1016_v4 = vld [vmem:[#allocation5 + $0x10] ss:$8 sps:$4 sm:$0xff]   ;;  %v101_v9 = vpack.c.bf16 %v100_v5, %v100_v5 }
  0x5c   :  { %143 = vmatpush1.bf16.msra.mxu0 %v1013_v2  ;;  %v1017_v6 = vld [vmem:[#allocation7 + $0x4] ss:$8 sps:$4 sm:$0xff]   ;;  %v1019_v7 = vld [vmem:[#allocation7] ss:$8 sps:$4 sm:$0xff]   ;;  %v1020_v8 = vld [vmem:[#allocation7 + $0x14] ss:$8 sps:$4 sm:$0xff]  }
  0x5d   :  { %144 = vmatprep.subr.bf16.mxu0 %v1014_v3  ;;  %395 = vmatprep.subr.bf16.mxu1 %v1017_v6  ;;  %v1022_v10 = vld [vmem:[#allocation7 + $0x10] ss:$8 sps:$4 sm:$0xff]   ;;  %vm138_vm0 = vcmask 261120   ;;  %v1023_v11 = vld [vmem:[#allocation7 + $0x24] ss:$8 sps:$4 sm:$0xff]   ;;  %v108_v3 = vlaneseq  ;;  %s1281_s12 = smov [#allocation11]  }
  0x5e   :  { %396 = vmatpush1.bf16.msra.mxu1 %v1019_v7  ;;  %v1025_v12 = vld [vmem:[#allocation7 + $0x20] ss:$8 sps:$4 sm:$0xff]   ;;  %v1026_v13 = vld [vmem:[#allocation7 + $0x34] ss:$8 sps:$4 sm:$0xff]   ;;  %v1028_v14 = vld [vmem:[#allocation7 + $0x30] ss:$8 sps:$4 sm:$0xff]  }
  0x5f   :  { %397 = vmatprep.subr.bf16.mxu1 %v1020_v8  ;;  %v1029_v15 = vld [vmem:[#allocation7 + $0x44] ss:$8 sps:$4 sm:$0xff]   ;;  %v1031_v16 = vld [vmem:[#allocation7 + $0x40] ss:$8 sps:$4 sm:$0xff]   ;;  %v1032_v17 = vld [vmem:[#allocation7 + $0x54] ss:$8 sps:$4 sm:$0xff]  }
  0x60   :  { %145 = vmatpush1.bf16.msra.mxu0 %v1016_v4  ;;  %v1034_v18 = vld [vmem:[#allocation7 + $0x50] ss:$8 sps:$4 sm:$0xff]   ;;  %v1035_v19 = vld [vmem:[#allocation7 + $0x64] ss:$8 sps:$4 sm:$0xff]   ;;  %v1037_v20 = vld [vmem:[#allocation7 + $0x60] ss:$8 sps:$4 sm:$0xff]  }
  0x61   :  { %v1038_v21 = vld [vmem:[#allocation7 + $0x74] ss:$8 sps:$4 sm:$0xff]   ;;  %v1040_v22 = vld [vmem:[#allocation7 + $0x70] ss:$8 sps:$4 sm:$0xff]   ;;  %v1041_v23 = vld [vmem:[#allocation7 + $0x84] ss:$8 sps:$4 sm:$0xff]  }
  0x62   :  { %398 = vmatpush1.bf16.msra.mxu1 %v1022_v10  ;;  %v1043_v24 = vld [vmem:[#allocation7 + $0x80] ss:$8 sps:$4 sm:$0xff]   ;;  %v1044_v25 = vld [vmem:[#allocation7 + $0x94] ss:$8 sps:$4 sm:$0xff]   ;;  %v1046_v26 = vld [vmem:[#allocation7 + $0x90] ss:$8 sps:$4 sm:$0xff]  }
  0x63   :  { %896 = vmatmul.mubr.msk.bf16.vlgmr.msra.gmra.mrb[0].mxu0 %vm138_vm0, %v101_v9  ;;  %399 = vmatprep.subr.bf16.mxu1 %v1023_v11  ;;  %v1047_v27 = vld [vmem:[#allocation7 + $0xa4] ss:$8 sps:$4 sm:$0xff]   ;;  %v1049_v28 = vld [vmem:[#allocation7 + $0xa0] ss:$8 sps:$4 sm:$0xff]   ;;  %v1050_v29 = vld [vmem:[#allocation7 + $0xb4] ss:$8 sps:$4 sm:$0xff]  }
  0x64   :  { %v1052_v30 = vld [vmem:[#allocation7 + $0xb0] ss:$8 sps:$4 sm:$0xff]   ;;  %v1053_v31 = vld [vmem:[#allocation7 + $0xc4] ss:$8 sps:$4 sm:$0xff]   ;;  %v1055_v32 = vld [vmem:[#allocation7 + $0xc0] ss:$8 sps:$4 sm:$0xff]  }
  0x65   :  { %v1056_v33 = vld [vmem:[#allocation7 + $0xd4] ss:$8 sps:$4 sm:$0xff]   ;;  %v1058_v34 = vld [vmem:[#allocation7 + $0xd0] ss:$8 sps:$4 sm:$0xff]   ;;  %v1059_v35 = vld [vmem:[#allocation7 + $0xe4] ss:$8 sps:$4 sm:$0xff]  }
  0x66   :  { %400 = vmatpush1.bf16.msra.mxu1 %v1025_v12  ;;  %v1061_v36 = vld [vmem:[#allocation7 + $0xe0] ss:$8 sps:$4 sm:$0xff]   ;;  %v1062_v37 = vld [vmem:[#allocation7 + $0xf4] ss:$8 sps:$4 sm:$0xff]   ;;  %v1064_v38 = vld [vmem:[#allocation7 + $0xf0] ss:$8 sps:$4 sm:$0xff]  }
  0x67   :  { %401 = vmatprep.subr.bf16.mxu1 %v1026_v13  ;;  %v1065_v39 = vld [vmem:[#allocation8] ss:$8 sps:$4 sm:$0xff]   ;;  %v1067_v40 = vld [vmem:[#allocation8 + $0x4] ss:$8 sps:$4 sm:$0xff]   ;;  %v1070_v41 = vld [vmem:[#allocation8 + $0x14] ss:$8 sps:$4 sm:$0xff]  }
  0x68   :  { %648 = vmatprep.subr.bf16.mxu0 %v1067_v40  ;;  %v1068_v42 = vld [vmem:[#allocation8 + $0x10] ss:$8 sps:$4 sm:$0xff]   ;;  %v1073_v43 = vld [vmem:[#allocation8 + $0x24] ss:$8 sps:$4 sm:$0xff]   ;;  %v1071_v44 = vld [vmem:[#allocation8 + $0x20] ss:$8 sps:$4 sm:$0xff]  }
  0x69   :  { %649 = vmatpush1.bf16.msra.mxu0 %v1065_v39  ;;  %v1076_v45 = vld [vmem:[#allocation8 + $0x34] ss:$8 sps:$4 sm:$0xff]   ;;  %v1074_v46 = vld [vmem:[#allocation8 + $0x30] ss:$8 sps:$4 sm:$0xff]   ;;  %v1079_v47 = vld [vmem:[#allocation8 + $0x44] ss:$8 sps:$4 sm:$0xff]  }
  0x6a   :  { %402 = vmatpush1.bf16.msra.mxu1 %v1028_v14  ;;  %650 = vmatprep.subr.bf16.mxu0 %v1070_v41  ;;  %v1077_v48 = vld [vmem:[#allocation8 + $0x40] ss:$8 sps:$4 sm:$0xff]   ;;  %v1082_v49 = vld [vmem:[#allocation8 + $0x54] ss:$8 sps:$4 sm:$0xff]   ;;  %v1080_v50 = vld [vmem:[#allocation8 + $0x50] ss:$8 sps:$4 sm:$0xff]  }
  0x6b   :  { %403 = vmatprep.subr.bf16.mxu1 %v1029_v15  ;;  %v1085_v51 = vld [vmem:[#allocation8 + $0x64] ss:$8 sps:$4 sm:$0xff]   ;;  %v1083_v52 = vld [vmem:[#allocation8 + $0x60] ss:$8 sps:$4 sm:$0xff]   ;;  %v1088_v53 = vld [vmem:[#allocation8 + $0x74] ss:$8 sps:$4 sm:$0xff]  }
  0x6c   :  { %v1086_v54 = vld [vmem:[#allocation8 + $0x70] ss:$8 sps:$4 sm:$0xff]   ;;  %v1091_v55 = vld [vmem:[#allocation8 + $0x84] ss:$8 sps:$4 sm:$0xff]   ;;  %v1089_v56 = vld [vmem:[#allocation8 + $0x80] ss:$8 sps:$4 sm:$0xff]  }
  0x6d   :  { %651 = vmatpush1.bf16.msra.mxu0 %v1068_v42  ;;  %v1094_v57 = vld [vmem:[#allocation8 + $0x94] ss:$8 sps:$4 sm:$0xff]   ;;  %v1092_v58 = vld [vmem:[#allocation8 + $0x90] ss:$8 sps:$4 sm:$0xff]   ;;  %v1097_v59 = vld [vmem:[#allocation8 + $0xa4] ss:$8 sps:$4 sm:$0xff]  }
  0x6e   :  { %404 = vmatpush1.bf16.msra.mxu1 %v1031_v16  ;;  %652 = vmatprep.subr.bf16.mxu0 %v1073_v43  ;;  %v1095_v60 = vld [vmem:[#allocation8 + $0xa0] ss:$8 sps:$4 sm:$0xff]   ;;  %v1100_v61 = vld [vmem:[#allocation8 + $0xb4] ss:$8 sps:$4 sm:$0xff]   ;;  %v1098_v62 = vld [vmem:[#allocation8 + $0xb0] ss:$8 sps:$4 sm:$0xff]  }
  0x6f   :  { %405 = vmatprep.subr.bf16.mxu1 %v1032_v17  ;;  %v1103_v63 = vld [vmem:[#allocation8 + $0xc4] ss:$8 sps:$4 sm:$0xff]   ;;  %v1101_v0 = vld [vmem:[#allocation8 + $0xc0] ss:$8 sps:$4 sm:$0xff]   ;;  %v1106_v1 = vld [vmem:[#allocation8 + $0xd4] ss:$8 sps:$4 sm:$0xff]  }
  0x70   :  { %v1104_v2 = vld [vmem:[#allocation8 + $0xd0] ss:$8 sps:$4 sm:$0xff]   ;;  %v109_v4 = vshrl.u32 %v108_v3, 7  ;;  %s881_s13 = sshll.u32 %s1281_s12, 4  ;;  %s882_s13 = int_to_ptr.vmem [resolvable:$true] %s881_s13 }
  0x71   :  { %653 = vmatpush1.bf16.msra.mxu0 %v1071_v44  ;;  %v106_v6 = vld [vmem:[%s1437_s2] sm:$0x3]  ;;  %s1241_s1 = scalar_lea.vmem %s882_s13, 64  ;;  %p1246_p13 = scmp.lt.s32.totalorder %s882_s13, %s882_s13 }
  0x72   :  { %406 = vmatpush1.bf16.msra.mxu1 %v1034_v18  ;;  %654 = vmatprep.subr.bf16.mxu0 %v1076_v45  ;;  %v1401_v5 = vsub.s32 0, %v109_v4  ;;  %v1406_v7 = vsub.s32 1, %v109_v4  ;;  %p1242_p12 = scmp.ne.s32.totalorder %s882_s13, %s1241_s1  ;;  %p1247_p0 = scmp.lt.s32.totalorder %s1241_s1, %s1241_s1 }
  0x73   :  { %407 = vmatprep.subr.bf16.mxu1 %v1035_v19 }
  0x74   :  { %v111_v8 = vrot.slane %v106_v6, %v1401_v5  ;;  %v115_v9 = vrot.slane %v106_v6, %v1406_v7  ;;  %p1248_p1 = por %p1247_p0, %p1246_p13 }
  0x75   :  { %655 = vmatpush1.bf16.msra.mxu0 %v1074_v46 }
  0x76   :  { %408 = vmatpush1.bf16.msra.mxu1 %v1037_v20  ;;  %656 = vmatprep.subr.bf16.mxu0 %v1079_v47  ;;  %p1249_p2 = pnand %p1248_p1, %p1242_p12 }
  0x77   :  { %409 = vmatprep.subr.bf16.mxu1 %v1038_v21 }
  0x79   :  { %657 = vmatpush1.bf16.msra.mxu0 %v1077_v48 }
  0x7a   :  { %410 = vmatpush1.bf16.msra.mxu1 %v1040_v22  ;;  %658 = vmatprep.subr.bf16.mxu0 %v1082_v49  ;;  %v1109_v22 = vld [vmem:[#allocation8 + $0xe4] ss:$8 sps:$4 sm:$0xff]  }
  0x7b   :  { %411 = vmatprep.subr.bf16.mxu1 %v1041_v23  ;;  %v1107_v23 = vld [vmem:[#allocation8 + $0xe0] ss:$8 sps:$4 sm:$0xff]  }
  0x7d   :  { %659 = vmatpush1.bf16.msra.mxu0 %v1080_v50 }
  0x7e   :  { %412 = vmatpush1.bf16.msra.mxu1 %v1043_v24  ;;  %660 = vmatprep.subr.bf16.mxu0 %v1085_v51  ;;  %v1112_v24 = vld [vmem:[#allocation8 + $0xf4] ss:$8 sps:$4 sm:$0xff]  }
  0x7f   :  { %413 = vmatprep.subr.bf16.mxu1 %v1044_v25  ;;  %v1110_v25 = vld [vmem:[#allocation8 + $0xf0] ss:$8 sps:$4 sm:$0xff]  }
  0x81   :  { %661 = vmatpush1.bf16.msra.mxu0 %v1083_v52 }
  0x82   :  { %414 = vmatpush1.bf16.msra.mxu1 %v1046_v26  ;;  %662 = vmatprep.subr.bf16.mxu0 %v1088_v53  ;;  %v1113_v26 = vld [vmem:[#allocation10 + $0x40] sm:$0xff]   ;;  %v1125_v53 = vld [vmem:[#allocation10 + $0x70] sm:$0xff]  }
  0x83   :  { %415 = vmatprep.subr.bf16.mxu1 %v1047_v27  ;;  %v1114_v27 = vld [vmem:[#allocation10] sm:$0xff]  }
  0x85   :  { %663 = vmatpush1.bf16.msra.mxu0 %v1086_v54  ;;  %v1126_v54 = vld [vmem:[#allocation10 + $0x30] sm:$0xff]  }
  0x86   :  { %416 = vmatpush1.bf16.msra.mxu1 %v1049_v28  ;;  %664 = vmatprep.subr.bf16.mxu0 %v1091_v55  ;;  %v1115_v28 = vld [vmem:[#allocation10 + $0x48] sm:$0xff]   ;;  %v1127_v55 = vld [vmem:[#allocation10 + $0x78] sm:$0xff]  }
  0x87   :  { %417 = vmatprep.subr.bf16.mxu1 %v1050_v29  ;;  %v1116_v29 = vld [vmem:[#allocation10 + $0x8] sm:$0xff]  }
  0x89   :  { %665 = vmatpush1.bf16.msra.mxu0 %v1089_v56  ;;  %v1128_v56 = vld [vmem:[#allocation10 + $0x38] sm:$0xff]  }
  0x8a   :  { %418 = vmatpush1.bf16.msra.mxu1 %v1052_v30  ;;  %666 = vmatprep.subr.bf16.mxu0 %v1094_v57  ;;  %v1117_v30 = vld [vmem:[#allocation10 + $0x50] sm:$0xff]   ;;  %v476_v57 = vld [vmem:[%s1441_s6] sm:$0x3] }
  0x8b   :  { %419 = vmatprep.subr.bf16.mxu1 %v1053_v31  ;;  %v1118_v31 = vld [vmem:[#allocation10 + $0x10] sm:$0xff]  }
  0x8d   :  { %667 = vmatpush1.bf16.msra.mxu0 %v1092_v58  ;;  %v481_v58 = vrot.slane %v476_v57, %v1401_v5 }
  0x8e   :  { %420 = vmatpush1.bf16.msra.mxu1 %v1055_v32  ;;  %668 = vmatprep.subr.bf16.mxu0 %v1097_v59  ;;  %v1119_v32 = vld [vmem:[#allocation10 + $0x58] sm:$0xff]   ;;  %v485_v59 = vrot.slane %v476_v57, %v1406_v7 }
  0x8f   :  { %421 = vmatprep.subr.bf16.mxu1 %v1056_v33  ;;  %v1120_v33 = vld [vmem:[#allocation10 + $0x18] sm:$0xff]  }
  0x91   :  { %669 = vmatpush1.bf16.msra.mxu0 %v1095_v60 }
  0x92   :  { %422 = vmatpush1.bf16.msra.mxu1 %v1058_v34  ;;  %670 = vmatprep.subr.bf16.mxu0 %v1100_v61  ;;  %v1121_v34 = vld [vmem:[#allocation10 + $0x60] sm:$0xff]  }
  0x93   :  { %423 = vmatprep.subr.bf16.mxu1 %v1059_v35  ;;  %v1122_v35 = vld [vmem:[#allocation10 + $0x20] sm:$0xff]  }
  0x95   :  { %671 = vmatpush1.bf16.msra.mxu0 %v1098_v62 }
  0x96   :  { %424 = vmatpush1.bf16.msra.mxu1 %v1061_v36  ;;  %672 = vmatprep.subr.bf16.mxu0 %v1103_v63  ;;  %v1123_v36 = vld [vmem:[#allocation10 + $0x68] sm:$0xff]  }
  0x97   :  { %425 = vmatprep.subr.bf16.mxu1 %v1062_v37  ;;  %v1124_v37 = vld [vmem:[#allocation10 + $0x28] sm:$0xff]  }
  0x99   :  { %673 = vmatpush1.bf16.msra.mxu0 %v1101_v0 }
  0x9a   :  { %426 = vmatpush1.bf16.msra.mxu1 %v1064_v38  ;;  %674 = vmatprep.subr.bf16.mxu0 %v1106_v1  ;;  %v223_v38 = vld [vmem:[%s1439_s4] sm:$0x3] }
  0x9b   :  { %978 = vmatprep.subr.bf16.mxu1 %v1113_v26  ;;  %v228_v39 = vrot.slane %v223_v38, %v1401_v5  ;;  %v232_v40 = vrot.slane %v223_v38, %v1406_v7  ;;  %v961_v5 = vld [vmem:[%s1443_s8] ss:$0 sm:$0xff] }
  0x9d   :  { %675 = vmatpush1.bf16.msra.mxu0 %v1104_v2 }
  0x9e   :  { %676 = vmatprep.subr.bf16.mxu0 %v1109_v22 }
  0xa1   :  { %677 = vmatpush1.bf16.msra.mxu0 %v1107_v23 }
  0xa2   :  { %678 = vmatprep.subr.bf16.mxu0 %v1112_v24 }
  0xa5   :  { %679 = vmatpush1.bf16.msra.mxu0 %v1110_v25 }
 0x136   :  { %v176_v10 = vpop.f32.mrb[0].mxu0 }
 0x137   :  { %v177_v11 = vadd.f32 %v176_v10, %v111_v8  ;;  %v178_v12 = vpop.f32.mrb[1].mxu0 }
 0x138   :  { %v179_v13 = vadd.f32 %v178_v12, %v115_v9  ;;  %v180_v14 = vpop.f32.mrb[2].mxu0 }
 0x139   :  { %vm183_vm1 = vcmp.gt.f32.partialorder %v177_v11, 0.0  ;;  %v185_v15 = vmul.f32 0.1, %v177_v11  ;;  %v181_v16 = vpop.f32.mrb[3].mxu0 }
 0x13a   :  { %vm184_vm2 = vcmp.gt.f32.partialorder %v179_v13, 0.0  ;;  %v186_v17 = vmul.f32 0.1, %v179_v13 }
 0x13b   :  { %v187_v18 = vsel %vm183_vm1, %v177_v11, %v185_v15 }
 0x13c   :  { %v188_v19 = vsel %vm184_vm2, %v179_v13, %v186_v17  ;;  %v189_v21 = vpack.c.bf16 %v187_v18, %v187_v18 }
 0x13d   :  { %v190_v20 = vpack.c.bf16 %v188_v19, %v188_v19 }
 0x13f   :  { %427 = vmatprep.mubr.bf16.mxu1 %v190_v20 }
 0x140   :  { %428 = vmatmul.mubr.bf16.vlgmr.msra.gmra.mrb[0].mxu1 %v189_v21 }
 0x141   :  { %979 = vmatpush3.bf16.msra.mxu1 %v1114_v27 }
 0x142   :  { %980 = vmatprep.subr.bf16.mxu1 %v1115_v28 }
 0x145   :  { %981 = vmatpush3.bf16.msra.mxu1 %v1116_v29 }
 0x146   :  { %982 = vmatprep.subr.bf16.mxu1 %v1117_v30 }
 0x149   :  { %983 = vmatpush3.bf16.msra.mxu1 %v1118_v31 }
 0x14a   :  { %984 = vmatprep.subr.bf16.mxu1 %v1119_v32 }
 0x14d   :  { %985 = vmatpush3.bf16.msra.mxu1 %v1120_v33 }
 0x14e   :  { %986 = vmatprep.subr.bf16.mxu1 %v1121_v34 }
 0x151   :  { %987 = vmatpush3.bf16.msra.mxu1 %v1122_v35 }
 0x152   :  { %988 = vmatprep.subr.bf16.mxu1 %v1123_v36 }
 0x155   :  { %989 = vmatpush3.bf16.msra.mxu1 %v1124_v37 }
 0x156   :  { %990 = vmatprep.subr.bf16.mxu1 %v1125_v53 }
 0x159   :  { %991 = vmatpush3.bf16.msra.mxu1 %v1126_v54 }
 0x15a   :  { %992 = vmatprep.subr.bf16.mxu1 %v1127_v55 }
 0x15d   :  { %993 = vmatpush3.bf16.msra.mxu1 %v1128_v56 }
 0x213   :  { %v429_v41 = vpop.f32.mrb[0].mxu1 }
 0x214   :  { %v430_v42 = vadd.f32 %v429_v41, %v228_v39  ;;  %v431_v43 = vpop.f32.mrb[1].mxu1 }
 0x215   :  { %v432_v44 = vadd.f32 %v431_v43, %v232_v40  ;;  %v433_v45 = vpop.f32.mrb[2].mxu1 }
 0x216   :  { %vm436_vm3 = vcmp.gt.f32.partialorder %v430_v42, 0.0  ;;  %v438_v46 = vmul.f32 0.1, %v430_v42  ;;  %v434_v47 = vpop.f32.mrb[3].mxu1 }
 0x217   :  { %vm437_vm4 = vcmp.gt.f32.partialorder %v432_v44, 0.0  ;;  %v439_v48 = vmul.f32 0.1, %v432_v44 }
 0x218   :  { %v440_v49 = vsel %vm436_vm3, %v430_v42, %v438_v46 }
 0x219   :  { %v441_v50 = vsel %vm437_vm4, %v432_v44, %v439_v48  ;;  %v442_v52 = vpack.c.bf16 %v440_v49, %v440_v49 }
 0x21a   :  { %v443_v51 = vpack.c.bf16 %v441_v50, %v441_v50 }
 0x21c   :  { %680 = vmatprep.mubr.bf16.mxu0 %v443_v51 }
 0x21d   :  { %681 = vmatmul.mubr.bf16.vlgmr.msra.gmra.mrb[4].mxu0 %v442_v52 }
 0x2f0   :  { %v682_v60 = vpop.f32.mrb[4].mxu0 }
 0x2f1   :  { %v683_v61 = vadd.f32 %v682_v60, %v481_v58  ;;  %v684_v62 = vpop.f32.mrb[5].mxu0 }
 0x2f2   :  { %v685_v63 = vadd.f32 %v684_v62, %v485_v59  ;;  %v686_v0 = vpop.f32.mrb[6].mxu0 }
 0x2f3   :  { %vm689_vm5 = vcmp.gt.f32.partialorder %v683_v61, 0.0  ;;  %v691_v1 = vmul.f32 0.1, %v683_v61  ;;  %v687_v2 = vpop.f32.mrb[7].mxu0 }
 0x2f4   :  { %vm690_vm6 = vcmp.gt.f32.partialorder %v685_v63, 0.0  ;;  %v692_v3 = vmul.f32 0.1, %v685_v63 }
 0x2f5   :  { %v693_v4 = vsel %vm689_vm5, %v683_v61, %v691_v1 }
 0x2f6   :  { %v694_v6 = vsel %vm690_vm6, %v685_v63, %v692_v3  ;;  %v695_v9 = vpack.c.bf16 %v693_v4, %v693_v4 }
 0x2f7   :  { %v696_v8 = vpack.c.bf16 %v694_v6, %v694_v6 }
 0x2f9   :  { %864 = vmatprep.mubr.bf16.mxu1 %v696_v8 }
 0x2fa   :  { %865 = vmatmul.mubr.bf16.vlgmr.msra.gmra.mrb[4].mxu1 %v695_v9 }
 0x3cd   :  { %v994_v10 = vpop.f32.mrb[4].mxu1 }
 0x3ce   :  { %v995_v7 = vpop.f32.mrb[5].mxu1 }
 0x3cf   :  { %v996_v11 = vadd.f32 %v995_v7, %v994_v10  ;;  %v997_v12 = vpop.f32.mrb[6].mxu1 }
 0x3d0   :  { %v998_v13 = vpop.f32.mrb[7].mxu1 }
 0x3d1   :  { %v867_v14 = vadd.f32 %v996_v11, %v961_v5 }
 0x3d3   :  { %1129 = vtanh.f32 %v867_v14 }
 0x3dd   :  { %v1130_v15 = vpop.eup %1129 }
 0x3de   :  { %v873_v16 = vpack.c.bf16 %v1130_v15, %v1130_v15 }
 0x3e0   :  { %874 = vst [vmem:[#allocation11] sm:$0xf] %v873_v16 }
 0x3e1   :  { %1252 = shalt.err (!%p1249_p2)
}
 0x3e2   :  { %s1253_s14 = scalar_lea.hbm %s1444_s9, 64 }
 0x3e3   :  { %p1254_p3 = scmp.ne.s32.totalorder %s1444_s9, %s1253_s14  ;;  %p1257_p4 = scmp.lt.u32.totalorder %s1253_s14, %s1444_s9 }
 0x3e5   :  { %p1259_p5 = pnand %p1257_p4, %p1254_p3 }
 0x3e7   :  { %1262 = shalt.err (!%p1259_p5)
}
 0x3e8   :  { %884 = dma.vmem_to_hbm [thread:$0]  %s882_s13, 64, %s1444_s9, [#allocation4]  }
 0x3e9   :  { %1269 = dma.done.wait [#allocation4], 64  }
 0x3ea   :  { %1270 = vsyncadd [#allocation4], 4294967232 }
 0x3eb   :  { %888 = vsyncpa [#allocation3], 1 }
 0x3ec   :  { %889 = vsyncpa [#allocation6], 1 }
 0x3ed   :  { %890 = vsyncpa [#allocation9], 1 }
 0x3ee   :  { %891 = vsyncpa [#allocation4], 1 }

</bundles_post_ra>
